<compile_context>
chip_gen: v5e
topology: v5e:2x2
jax: 0.10.0
libtpu: 0.0.40
codegen_flags: <defaults>
</compile_context>

<pallas_src>
import math

import jax
import jax.numpy as jnp
from jax import lax
from jax.experimental import pallas as pl
from jax.experimental.pallas import tpu as pltpu

_LANES = 128


def _sos_kernel(y_ref, s_ref, o_ref):
    # y_ref: (block_rows, C)  tile of the (R, C) row-grouped view of Y
    # s_ref: (C, G)           block-diagonal beta expansion (f32, VMEM resident)
    # o_ref: (block_rows, G)  G utilities per reshaped row (lane-dense)
    y = y_ref[...].astype(jnp.float32)          # f32 accumulation path
    o_ref[...] = jnp.dot(
        y * y,                                  # square on the VPU
        s_ref[...],                             # beta-weighted group-sum on the MXU
        preferred_element_type=jnp.float32,
        precision=lax.Precision.HIGHEST,        # exact f32 matmul accumulation
    ).astype(o_ref.dtype)


def _choose_group(n: int, k: int) -> int:
    """Outputs per reshaped row (G).  C = G*K is the reshaped row width.

    G must divide N exactly so the (N,K)->(R,C) reshape and the (R,G)->(N,)
    un-reshape are free bitcasts (no pad, no slice).  Prefer G*K a multiple of
    128 (full lane density); cap G so the (C, G) beta matrix stays small.
    """
    if n <= 0 or k <= 0:
        return 1
    if k >= _LANES:
        return 1                                  # row layout already lane-dense
    g_cap = max(1, math.isqrt((2 << 20) // (4 * k)))   # S = G*G*K*4 bytes <= 2 MiB
    g_cap = min(g_cap, _LANES, n)
    g0 = _LANES // math.gcd(k, _LANES)            # smallest G with (G*K) % 128 == 0
    best = 1
    for g in range(g_cap, 0, -1):
        if n % g:
            continue
        if g % g0 == 0:
            return g                              # largest lane-aligned divisor of N
        if best == 1:
            best = g                              # largest plain divisor as fallback
    return best


def _choose_block_rows(r: int, c: int, itemsize: int) -> int:
    """Rows of the (R, C) view per grid step (explicit VMEM-aware budget)."""
    min_sub = max(8, 32 // itemsize)              # sublane granule: 8 f32, 16 bf16
    if r <= min_sub:
        return r                                  # single (full-extent) block
    bytes_per_row = pl.cdiv(c, _LANES) * _LANES * itemsize
    hi = max(1, (8 << 20) // bytes_per_row)       # <= ~8 MiB per (double-buffered) input tile
    lo = max(1, (1 << 19) // bytes_per_row)       # >= ~512 KiB: amortize ~0.35us/step overhead
    rows = min(hi, max(lo, pl.cdiv(r, 8)))        # aim for ~8 pipelined grid steps
    rows = max(min_sub, (rows // min_sub) * min_sub)
    # Guarantee >= 2 grid steps so both v7x TensorCores get work.
    rows = min(rows, pl.cdiv(pl.cdiv(r, 2), min_sub) * min_sub)
    return max(rows, min_sub)


def sum_of_squares_util(Y: jax.Array, beta: jax.Array) -> jax.Array:
    """Pallas TPU implementation of SumOfSquaresUtil.forward: square(Y) @ beta."""
    assert Y.ndim == 2, "Y must be (batch, output_dim)"
    n, k = Y.shape
    assert beta.shape == (k,), "beta must be (output_dim,)"
    out_dtype = Y.dtype
    if n == 0:
        return jnp.zeros((0,), dtype=out_dtype)

    # Keep beta in float32 (honest f32 accumulation).  torch's `beta.to(Y)`
    # would round it to bf16 for low-precision Y; we keep the accurate choice.
    beta_f32 = beta.astype(jnp.float32)

    # ---- free (bitcast) reshape: (N, K) -> (R, C), C = G*K, G | N ----------
    g = _choose_group(n, k)
    c = g * k
    r = n // g
    y_rows = Y.reshape(r, c)

    # Block-diagonal expansion of beta: S[g*K + q, g] = beta[q]  -> (C, G), f32.
    s_mat = (jnp.eye(g, dtype=jnp.float32)[:, None, :]
             * beta_f32[None, :, None]).reshape(c, g)

    itemsize = jnp.dtype(out_dtype).itemsize
    block_rows = _choose_block_rows(r, c, itemsize)
    grid = (pl.cdiv(r, block_rows),)

    # Explicit VMEM budget: double-buffered in/out tiles with lane + sublane
    # padding, the resident S matrix, plus slack for internal scratch.
    lane_c = pl.cdiv(c, _LANES) * _LANES
    lane_g = pl.cdiv(g, _LANES) * _LANES
    sub_rows = pl.cdiv(block_rows, 8) * 8
    in_bytes = sub_rows * lane_c * itemsize
    out_bytes = sub_rows * lane_g * itemsize
    s_bytes = pl.cdiv(c, 8) * 8 * lane_g * 4
    vmem_limit = 2 * in_bytes + 2 * out_bytes + 2 * s_bytes + (8 << 20)
    vmem_limit = int(min(max(vmem_limit, 32 << 20), 48 << 20))  # safe on v5e/v6e/v7x

    out2d = pl.pallas_call(
        _sos_kernel,
        out_shape=jax.ShapeDtypeStruct((r, g), out_dtype),
        grid=grid,
        in_specs=[
            pl.BlockSpec((block_rows, c), lambda i: (i, 0)),    # streamed Y row tiles
            pl.BlockSpec((c, g), lambda i: (0, 0)),             # resident beta matrix
        ],
        out_specs=pl.BlockSpec((block_rows, g), lambda i: (i, 0)),  # lane-dense rows
        compiler_params=pltpu.CompilerParams(
            dimension_semantics=("parallel",),
            vmem_limit_bytes=vmem_limit,
        ),
        cost_estimate=pl.CostEstimate(
            flops=3 * n * k,
            transcendentals=0,
            bytes_accessed=n * k * itemsize + n * itemsize + c * g * 4,
        ),
    )(y_rows, s_mat)

    # (R, G) -> (N,): exact, free reshape (G divides N by construction).
    return out2d.reshape(n)


if __name__ == "__main__":
    key = jax.random.PRNGKey(0)
    k_y1, k_y2, k_y3, k_b = jax.random.split(key, 4)

    K = 4  # output_dim, consistent with the module's small synthetic problems
    beta = jax.random.uniform(k_b, (K,), dtype=jnp.float32)

    # 1) Small, module-like shapes: batch of 8 outcome vectors, output_dim 4.
    Y1 = jax.random.normal(k_y1, (8, K), dtype=jnp.float32)
    out1 = jax.block_until_ready(sum_of_squares_util(Y1, beta))
    ref1 = jnp.square(Y1) @ beta
    assert out1.shape == (8,)
    assert jnp.allclose(out1, ref1, atol=1e-4, rtol=1e-4)

    # 2) Lane-aligned batch: G=128, C=512, multi-step pipelined grid.
    Y2 = jax.random.normal(k_y2, (4096, K), dtype=jnp.float32)
    out2 = jax.block_until_ready(sum_of_squares_util(Y2, beta))
    ref2 = jnp.square(Y2) @ beta
    assert out2.shape == (4096,)
    assert jnp.allclose(out2, ref2, atol=1e-4, rtol=1e-4)

    # 3) Batch not a multiple of 128: still no transpose / pad / slice
    #    (picks G=125, C=500; everything stays a free reshape).
    Y3 = jax.random.normal(k_y3, (1000, K), dtype=jnp.float32)
    out3 = jax.block_until_ready(sum_of_squares_util(Y3, beta))
    ref3 = jnp.square(Y3) @ beta
    assert out3.shape == (1000,)
    assert jnp.allclose(out3, ref3, atol=1e-4, rtol=1e-4)

    print("KERNEL_OK")
</pallas_src>

<mosaic_0001>
module attributes {stable_mosaic.version = 11 : i64} {
  func.func @_sos_kernel(%arg0: i32, %arg1: memref<1x32xf32, #tpu.memory_space<vmem>>, %arg2: memref<32x8xf32, #tpu.memory_space<vmem>>, %arg3: memref<1x8xf32, #tpu.memory_space<vmem>>) attributes {dimension_semantics = [#tpu.dimension_semantics<parallel>], iteration_bounds = array<i64: 1>, scalar_prefetch = 0 : i64, scratch_operands = 0 : i64, tpu.core_type = #tpu.core_type<tc>, window_params = [{transform_indices = @transform_0, window_bounds = array<i64: 1, 32>}, {pipeline_mode = #tpu.pipeline_mode<synchronous>, transform_indices = @transform_1, window_bounds = array<i64: 32, 8>}, {transform_indices = @transform_2, window_bounds = array<i64: 1, 8>}]} {
    %c0 = arith.constant 0 : index
    %c0_0 = arith.constant 0 : index
    %0 = vector.load %arg1[%c0, %c0_0] : memref<1x32xf32, #tpu.memory_space<vmem>>, vector<1x32xf32>
    %1 = arith.mulf %0, %0 : vector<1x32xf32>
    %c0_1 = arith.constant 0 : index
    %c0_2 = arith.constant 0 : index
    %2 = vector.load %arg2[%c0_1, %c0_2] : memref<32x8xf32, #tpu.memory_space<vmem>>, vector<32x8xf32>
    %cst = arith.constant dense<0.000000e+00> : vector<1x8xf32>
    %3 = tpu.matmul %1, %2, %cst {dimension_numbers = #tpu.dot_dimension_numbers<[1], [0], [0], [1], [0, 0, 1, 1], [], []>, precision = #tpu.contract_precision<fp32>} : vector<1x32xf32>, vector<32x8xf32>, vector<1x8xf32> -> vector<1x8xf32>
    %c0_3 = arith.constant 0 : index
    %c0_4 = arith.constant 0 : index
    %4 = vector.load %arg3[%c0_3, %c0_4] : memref<1x8xf32, #tpu.memory_space<vmem>>, vector<1x8xf32>
    tpu.vector_store %arg3[%c0_3, %c0_4], %3 {strides = array<i32>} : memref<1x8xf32, #tpu.memory_space<vmem>>, vector<1x8xf32>,
    return
  }
  func.func @transform_0(%arg0: i32) -> (i32, i32) {
    %c0_i32 = arith.constant 0 : i32
    %c0_i32_0 = arith.constant 0 : i32
    return %arg0, %c0_i32 : i32, i32
  }
  func.func @transform_1(%arg0: i32) -> (i32, i32) {
    %c0_i32 = arith.constant 0 : i32
    %c0_i32_0 = arith.constant 0 : i32
    %c0_i32_1 = arith.constant 0 : i32
    return %c0_i32, %c0_i32_0 : i32, i32
  }
  func.func @transform_2(%arg0: i32) -> (i32, i32) {
    %c0_i32 = arith.constant 0 : i32
    %c0_i32_0 = arith.constant 0 : i32
    return %arg0, %c0_i32 : i32, i32
  }
}

</mosaic_0001>

<bundles_post_ra>
// kernel: tpu_custom_call.1
= control target key start
LH: loop header
LB: loop body
LE: loop exit
PB: predicated region body
PF: predicated region fallthrough
CT: control target
= control target key end

     0   :  { %vm18_vm0 = vcmask 261120   ;;  %s286_s0 = inlined_call_operand.vmem [shape: f32[1,32], index: 0, kind: input, shape index: {}]   ;;  %s287_s1 = inlined_call_operand.vmem [shape: f32[32,8], index: 1, kind: input, shape index: {}]   ;;  %s288_s2 = inlined_call_operand.hbm [shape: f32[1,8], index: 2, kind: output, shape index: {}]  }
   0x1   :  { %v17_v0 = vld [vmem:[%s287_s1 + $0x18] sm:$0xff]  ;;  %v16_v1 = vld [vmem:[%s287_s1 + $0x10] sm:$0xff]  ;;  %v15_v2 = vld [vmem:[%s287_s1 + $0x8] sm:$0xff] }
   0x2   :  { %v34_v3 = vand.u32 4294901760, %v17_v0  ;;  %v36_v4 = vand.u32 4294901760, %v16_v1  ;;  %v38_v5 = vand.u32 4294901760, %v15_v2  ;;  %v14_v6 = vld [vmem:[%s287_s1] sm:$0xff] }
   0x3   :  { %v12_v7 = vld [vmem:[%s286_s0] sm:$0x1]  ;;  %v40_v8 = vand.u32 4294901760, %v14_v6 }
   0x4   :  { %v13_v9 = vmul.f32 %v12_v7, %v12_v7 }
   0x5   :  { %7 = vsyncpa [#allocation3], 0  ;;  %v64_v10 = vsub.f32 %v17_v0, %v34_v3  ;;  %35 = vmatpush.msra.mxu0 %v34_v3  ;;  %v70_v11 = vsub.f32 %v16_v1, %v36_v4  ;;  %135 = vmatpush.msra.mxu3 %v34_v3  ;;  %v76_v12 = vsub.f32 %v15_v2, %v38_v5  ;;  %s252_s0 = smov [#allocation2]   ;;  %s216_s21 = sshll.u32 %s288_s2, 4  ;;  %vm207_vm1 = vcmask 57344   ;;  %s217_s21 = int_to_ptr.hbm [resolvable:$true] %s216_s21 }
   0x6   :  { %v82_v13 = vsub.f32 %v14_v6, %v40_v8  ;;  %v20_v14 = vsel %vm18_vm0, %v13_v9, 0  ;;  %s214_s1 = sshll.u32 %s252_s0, 4  ;;  %s215_s1 = int_to_ptr.vmem [resolvable:$true] %s214_s1 }
   0x7   :  { %106 = vmatpush.msra.mxu2 %v64_v10  ;;  %37 = vmatpush.msra.mxu0 %v36_v4  ;;  %v65_v15 = vand.u32 4294901760, %v64_v10  ;;  %v71_v16 = vand.u32 4294901760, %v70_v11  ;;  %v42_v17 = vand.u32 4294901760, %v20_v14  ;;  %v77_v18 = vand.u32 4294901760, %v76_v12 }
   0x8   :  { %137 = vmatpush.msra.mxu3 %v36_v4  ;;  %v83_v19 = vand.u32 4294901760, %v82_v13 }
   0x9   :  { %109 = vmatpush.msra.mxu2 %v70_v11  ;;  %v66_v20 = vsub.f32 %v64_v10, %v65_v15  ;;  %39 = vmatpush.msra.mxu0 %v38_v5  ;;  %v72_v21 = vsub.f32 %v70_v11, %v71_v16  ;;  %v43_v22 = vsub.f32 %v20_v14, %v42_v17 }
   0xa   :  { %139 = vmatpush.msra.mxu3 %v38_v5  ;;  %v78_v23 = vsub.f32 %v76_v12, %v77_v18  ;;  %v84_v27 = vsub.f32 %v82_v13, %v83_v19 }
   0xb   :  { %v67_v24 = vand.u32 4294901760, %v66_v20  ;;  %112 = vmatpush.msra.mxu2 %v76_v12  ;;  %v73_v25 = vand.u32 4294901760, %v72_v21  ;;  %41 = vmatpush.msra.mxu0 %v40_v8  ;;  %v44_v26 = vand.u32 4294901760, %v43_v22 }
   0xc   :  { %141 = vmatpush.msra.mxu3 %v40_v8  ;;  %v79_v28 = vand.u32 4294901760, %v78_v23  ;;  %v85_v31 = vand.u32 4294901760, %v84_v27 }
   0xd   :  { %164 = vmatpush.msrb.mxu0 %v65_v15  ;;  %68 = vmatpush.msra.mxu1 %v67_v24  ;;  %v45_v29 = vsub.f32 %v43_v22, %v44_v26 }
   0xe   :  { %115 = vmatpush.msra.mxu2 %v82_v13  ;;  %145 = vmatmul.f32.vlgmr.msra.gmra.mxu3 %v44_v26 }
   0xf   :  { %118 = vmatmul.f32.vlgmr.msra.gmra.mxu2 %v43_v22  ;;  %74 = vmatpush.msra.mxu1 %v73_v25  ;;  %v46_v30 = vand.u32 4294901760, %v45_v29 }
  0x10   :  { %168 = vmatpush.msrb.mxu0 %v71_v16 }
  0x11   :  { %80 = vmatpush.msra.mxu1 %v79_v28  ;;  %47 = vmatmul.f32.vlgmr.msra.gmra.mxu0 %v46_v30 }
  0x12   :  { %172 = vmatpush.msrb.mxu0 %v77_v18 }
  0x13   :  { %86 = vmatpush.msra.mxu1 %v85_v31 }
  0x14   :  { %88 = vmatmul.f32.vlgmr.msra.gmra.mxu1 %v42_v17  ;;  %176 = vmatpush.msrb.mxu0 %v83_v19 }
  0x15   :  { %195 = vmatpush.msrb.mxu1 %v34_v3 }
  0x17   :  { %197 = vmatpush.msrb.mxu1 %v36_v4 }
  0x19   :  { %199 = vmatpush.msrb.mxu1 %v38_v5  ;;  %178 = vmatmul.f32.vlgmr.msrb.gmra.mxu0 %v42_v17 }
  0x1b   :  { %201 = vmatpush.msrb.mxu1 %v40_v8 }
  0x1c   :  { %203 = vmatmul.f32.vlgmr.msrb.gmra.mxu1 %v42_v17 }
  0x8e   :  { %v48_v32 = vpop.f32.mrf.mxu0 }
  0x91   :  { %v89_v33 = vpop.f32.mrf.mxu1  ;;  %v146_v36 = vpop.f32.mrf.mxu3 }
  0x92   :  { %v119_v34 = vpop.f32.mrf.mxu2  ;;  %v90_v35 = vadd.f32 %v89_v33, %v48_v32 }
  0x94   :  { %v120_v37 = vadd.f32 %v119_v34, %v90_v35 }
  0x96   :  { %v147_v38 = vadd.f32 %v146_v36, %v120_v37  ;;  %v179_v39 = vpop.f32.mrf.mxu0 }
  0x98   :  { %v180_v40 = vadd.f32 %v179_v39, %v147_v38 }
  0x99   :  { %v204_v41 = vpop.f32.mrf.mxu1 }
  0x9a   :  { %v205_v42 = vadd.f32 %v204_v41, %v180_v40 }
  0x9c   :  { %208 = vst.msk [vmem:[#allocation2] sm:$0x1] %vm207_vm1, %v205_v42 }
  0x9d   :  { %219 = dma.vmem_to_hbm [thread:$0]  %s215_s1, 16, %s217_s21, [#allocation3]  }
  0x9e   :  { %250 = dma.done.wait [#allocation3], 16  }
  0x9f   :  { %251 = vsyncadd [#allocation3], 4294967280 }
  0xa0   :  { %224 = vsyncpa [#allocation3], 1 }

</bundles_post_ra>
